<compile_context>
chip_gen: v7x
topology: tpu7x:2x2x1
jax: 0.10.0
libtpu: 0.0.40
codegen_flags: <defaults>
</compile_context>

<pallas_src>
import numpy as np
import jax
import jax.numpy as jnp
from jax import lax
from jax.experimental import pallas as pl
from jax.experimental.pallas import tpu as pltpu

HIDDEN = 32            # hidden_dim
INNER_MULT = 2         # _inner_mlp_mult
BN_EPS = 1e-5          # torch.nn.BatchNorm1d default eps

_VMEM_SPEC = pl.BlockSpec(memory_space=pltpu.MemorySpace.VMEM)


# -----------------------------------------------------------------------------
# In-kernel helpers
# -----------------------------------------------------------------------------
def _bn_relu(x, gamma, beta, n_valid, row_mask=None):
    """BatchNorm1d (training-mode batch stats, biased variance) + ReLU.

    Rows >= n_valid must be zero on entry; they contribute nothing to the sums
    and are excluded from the centered second moment via `row_mask`.
    rsqrt goes to the EUP slot.
    """
    inv = 1.0 / float(n_valid)
    mu = jnp.sum(x, axis=0, keepdims=True) * inv
    d = x - mu
    if row_mask is not None:
        d = d * row_mask
    var = jnp.sum(d * d, axis=0, keepdims=True) * inv
    scale = gamma * lax.rsqrt(var + BN_EPS)
    shift = beta - mu * scale
    return jnp.maximum(x * scale + shift, 0.0)


def _make_edge_node_kernel(n_nodes, rows_e, rows_e_pad, hidden, mid):
    pad = rows_e_pad - rows_e
    o_copy = 0
    o_bcast = rows_e_pad
    o_ncopy = 2 * rows_e_pad
    o_nbcast = o_ncopy + n_nodes
    o_e2n = o_nbcast + n_nodes

    def kernel(x_node_ref, x_edge_ref, g_ref, w1_ref, w2_ref, bn_ref, out_ref):
        f32 = jnp.float32
        x_node = x_node_ref[...]                       # [N, H]
        x_edge = x_edge_ref[...]                       # [2E, H]
        bn = bn_ref[...]                               # [8, MID]

        # Stacked gather RHS [x_node ; x_edge ; zero pad] -> [N + 2E_pad, H].
        pieces = [x_node, x_edge]
        if pad:
            pieces.append(jnp.zeros((pad, hidden), f32))
        x_all = jnp.concatenate(pieces, axis=0)

        # ONE matmul performs every graph gather (node->edge copy & broadcast
        # linmaps, their precompositions with edge->node, and edge->node of the
        # raw edge features): g_pack is block-structured host-side.
        g = jnp.dot(g_ref[...].astype(f32), x_all, preferred_element_type=f32)

        copy = g[o_copy:o_copy + rows_e_pad]           # [2E_pad, H]
        bcast = g[o_bcast:o_bcast + rows_e_pad]        # [2E_pad, H]
        ncopy = g[o_ncopy:o_ncopy + n_nodes]           # [N, H]
        nbcast = g[o_nbcast:o_nbcast + n_nodes]        # [N, H]
        e2n = g[o_e2n:o_e2n + n_nodes]                 # [N, H]

        x_edge_p = x_all[n_nodes:n_nodes + rows_e_pad]  # [2E_pad, H]

        # edge_new = cat_channels(edge_rep, node2edge^2), zero-padded to 4H cols
        # so it row-stacks with node_in for the fused layer-1 matmul.
        # TODO(synk): ptens' intra-linmap channel ordering for the 1->1 gather
        # is library-defined; copy-map channels are placed before the broadcast.
        edge_new = jnp.concatenate(
            [x_edge_p, copy, bcast, jnp.zeros((rows_e_pad, hidden), f32)],
            axis=-1)                                    # [2E_pad, 4H]
        # node_in = cat([node_rep, edge2node], -1); edge2node precomposed
        # host-side into (G10@x_edge, G10AG@x_node, G10BG@x_node).
        node_in = jnp.concatenate([x_node, e2n, ncopy, nbcast], axis=-1)  # [N, 4H]

        # Fused layer 1 of both MLPs: one MXU launch.
        x1 = jnp.concatenate([edge_new, node_in], axis=0)        # [2E_pad+N, 4H]
        h1 = jnp.dot(x1, w1_ref[...].astype(f32), preferred_element_type=f32)

        if pad:
            emask_mid = (lax.broadcasted_iota(jnp.int32, (rows_e_pad, mid), 0)
                         < rows_e).astype(f32)                   # [2E_pad, MID]
            emask_h = emask_mid[:, :hidden]                      # [2E_pad, H]
        else:
            emask_mid = emask_h = None

        h_e = _bn_relu(h1[:rows_e_pad, :mid], bn[0:1, :], bn[1:2, :],
                       rows_e, emask_mid)
        h_n = _bn_relu(h1[rows_e_pad:, mid:], bn[2:3, :], bn[3:4, :], n_nodes)
        if emask_mid is not None:
            h_e = h_e * emask_mid    # keep padded rows zero for layer-2 stats

        # Fused layer 2 of both MLPs: one MXU launch.
        x2 = jnp.concatenate([h_e, h_n], axis=0)                  # [2E_pad+N, MID]
        h2 = jnp.dot(x2, w2_ref[...].astype(f32), preferred_element_type=f32)

        y_e = _bn_relu(h2[:rows_e_pad, :hidden], bn[4:5, :hidden],
                       bn[5:6, :hidden], rows_e, emask_h)
        y_n = _bn_relu(h2[rows_e_pad:, hidden:], bn[6:7, :hidden],
                       bn[7:8, :hidden], n_nodes)
        if emask_h is not None:
            y_e = y_e * emask_h      # deterministic zeros in padded output rows

        out_ref[...] = jnp.concatenate([y_e, y_n], axis=0)

    return kernel


# -----------------------------------------------------------------------------
# Wrapper
# -----------------------------------------------------------------------------
def edge_node_forward(x_node, x_edge, packed):
    g_pack, w1_pack, w2_pack, bn_pack, rows_e_pad = packed
    n, h = x_node.shape
    rows_e = x_edge.shape[0]
    mid = h * INNER_MULT
    out_rows = rows_e_pad + n

    kernel = _make_edge_node_kernel(n, rows_e, rows_e_pad, h, mid)

    flops = 2 * (g_pack.shape[0] * g_pack.shape[1] * h
                 + out_rows * (4 * h) * (2 * mid)
                 + out_rows * mid * (2 * h))
    bytes_accessed = ((x_node.size + x_edge.size + bn_pack.size + out_rows * h) * 4
                      + (g_pack.size + w1_pack.size + w2_pack.size) * 2)

    # TODO(synk): to use v7x's second TensorCore / v6e's wide MXU, batch many
    # graphs along a leading grid axis with dimension_semantics=("parallel",).
    out = pl.pallas_call(
        kernel,
        out_shape=jax.ShapeDtypeStruct((out_rows, h), jnp.float32),
        in_specs=[_VMEM_SPEC] * 6,
        out_specs=_VMEM_SPEC,
        cost_estimate=pl.CostEstimate(flops=int(flops),
                                      transcendentals=int(4 * mid),
                                      bytes_accessed=int(bytes_accessed)),
    )(x_node, x_edge, g_pack, w1_pack, w2_pack, bn_pack)

    node_out = out[rows_e_pad:]
    edge_out = out[:rows_e]
    return node_out, edge_out


# -----------------------------------------------------------------------------
# Host-side graph bookkeeping: dense gather matrices emulating ptens
# gather_from_ptensors for a fixed graph, fully precomposed & packed.
# -----------------------------------------------------------------------------
def build_gathers(edges, num_nodes):
    edges = np.asarray(edges, dtype=np.int32)          # [E, 2]
    E = edges.shape[0]
    rows_e = 2 * E
    rows_e_pad = -(-rows_e // 8) * 8
    atom = np.empty(rows_e, np.int32)                  # node id of each edge row
    atom[0::2] = edges[:, 0]
    atom[1::2] = edges[:, 1]
    edge_of_row = np.arange(rows_e) // 2

    in_dom = np.zeros((E, num_nodes), np.float32)      # edge domain membership
    in_dom[np.arange(E), edges[:, 0]] = 1.0
    in_dom[np.arange(E), edges[:, 1]] = 1.0

    # ptensors0 -> subgraphlayer1 (node->edge): row j receives x_node[atom[j]].
    G01 = np.zeros((rows_e, num_nodes), np.float32)
    G01[np.arange(rows_e), atom] = 1.0
    # subgraphlayer1 -> subgraphlayer1 (edge->edge) linmaps: copy + broadcast.
    A_copy = (atom[:, None] == atom[None, :]).astype(np.float32)
    B = (in_dom[edge_of_row[:, None], atom[None, :]] *
         in_dom[edge_of_row[None, :], atom[:, None]]).astype(np.float32)
    # subgraphlayer1 -> subgraphlayer0 (edge->node): sum rows per node.
    G10 = G01.T.copy()

    # Fixed graph => precompose everything reachable from the inputs.
    AG = A_copy @ G01            # [2E, N]
    BG = B @ G01                 # [2E, N]
    G10AG = G10 @ AG             # [N, N]
    G10BG = G10 @ BG             # [N, N]

    # One block-structured gather operand: a single matmul against
    # [x_node ; x_edge_pad] yields every gathered quantity.
    n = num_nodes
    M = 2 * rows_e_pad + 3 * n
    K = n + rows_e_pad
    g_pack = np.zeros((M, K), np.float32)
    g_pack[0:rows_e, 0:n] = AG
    g_pack[rows_e_pad:rows_e_pad + rows_e, 0:n] = BG
    o = 2 * rows_e_pad
    g_pack[o:o + n, 0:n] = G10AG
    g_pack[o + n:o + 2 * n, 0:n] = G10BG
    g_pack[o + 2 * n:o + 3 * n, n:n + rows_e] = G10
    # Small-integer entries => exactly representable in bf16 (halves DMA bytes).
    g_pack = jnp.asarray(g_pack, dtype=jnp.bfloat16)

    raw = (jnp.asarray(AG), jnp.asarray(BG), jnp.asarray(G10))
    return g_pack, rows_e_pad, raw


# -----------------------------------------------------------------------------
# Deterministic parameter init + host-side packing (BN gamma=1, beta=0)
# -----------------------------------------------------------------------------
def init_params(key, hidden):
    mid = hidden * INNER_MULT
    k1, k2, k3, k4 = jax.random.split(key, 4)
    ew1 = (jax.random.normal(k1, (3 * hidden, mid), jnp.float32)
           / np.sqrt(3 * hidden)).astype(jnp.bfloat16)
    ew2 = (jax.random.normal(k2, (mid, hidden), jnp.float32)
           / np.sqrt(mid)).astype(jnp.bfloat16)
    nw1 = (jax.random.normal(k3, (4 * hidden, mid), jnp.float32)
           / np.sqrt(4 * hidden)).astype(jnp.bfloat16)
    nw2 = (jax.random.normal(k4, (mid, hidden), jnp.float32)
           / np.sqrt(mid)).astype(jnp.bfloat16)

    # Fused layer-1 weight [4H, 2*MID]: cols [:MID] = ew1 zero-padded to 4H rows,
    # cols [MID:] = nw1.  Fused layer-2 weight [MID, 2H] = [ew2 | nw2].
    w1_pack = jnp.zeros((4 * hidden, 2 * mid), jnp.bfloat16)
    w1_pack = w1_pack.at[:3 * hidden, :mid].set(ew1)
    w1_pack = w1_pack.at[:, mid:].set(nw1)
    w2_pack = jnp.concatenate([ew2, nw2], axis=-1)

    # BN affine params packed into one f32 slab; rows:
    # 0 eg1, 1 eb1, 2 ng1, 3 nb1, 4 eg2, 5 eb2, 6 ng2, 7 nb2.
    bn = np.zeros((8, mid), np.float32)
    bn[0, :] = 1.0
    bn[2, :] = 1.0
    bn[4, :hidden] = 1.0
    bn[6, :hidden] = 1.0
    bn_pack = jnp.asarray(bn)

    raw = (ew1, ew2, nw1, nw2)
    return w1_pack, w2_pack, bn_pack, raw


# -----------------------------------------------------------------------------
# Plain-JAX reference of the same forward pass (for a numerical cross-check)
# -----------------------------------------------------------------------------
def reference_forward(x_node, x_edge, gmats, weights):
    AG, BG, G10 = gmats
    ew1, ew2, nw1, nw2 = [w.astype(jnp.float32) for w in weights]
    P = lax.Precision.HIGHEST

    def bn_relu(h):  # gamma=1, beta=0 at init
        mu = jnp.mean(h, axis=0, keepdims=True)
        var = jnp.mean(jnp.square(h - mu), axis=0, keepdims=True)
        return jnp.maximum((h - mu) / jnp.sqrt(var + BN_EPS), 0.0)

    def mlp(x, w1, w2):
        return bn_relu(jnp.dot(bn_relu(jnp.dot(x, w1, precision=P)),
                               w2, precision=P))

    copy = jnp.dot(AG, x_node, precision=P)
    bcast = jnp.dot(BG, x_node, precision=P)
    edge_new = jnp.concatenate([x_edge, copy, bcast], axis=-1)
    edge2node = jnp.dot(G10, edge_new, precision=P)
    node_in = jnp.concatenate([x_node, edge2node], axis=-1)
    return mlp(node_in, nw1, nw2), mlp(edge_new, ew1, ew2)


if __name__ == "__main__":
    key = jax.random.PRNGKey(0)
    k_node, k_edge, k_params = jax.random.split(key, 3)

    num_nodes = 8
    # small deterministic graph: ring + two chords
    edges = [(0, 1), (1, 2), (2, 3), (3, 4), (4, 5),
             (5, 6), (6, 7), (7, 0), (0, 4), (2, 6)]
    E = len(edges)

    x_node = jax.random.normal(k_node, (num_nodes, HIDDEN), jnp.float32)  # ptensors0
    x_edge = jax.random.normal(k_edge, (2 * E, HIDDEN), jnp.float32)      # ptensors1

    g_pack, rows_e_pad, gmats_raw = build_gathers(edges, num_nodes)
    w1_pack, w2_pack, bn_pack, weights_raw = init_params(k_params, HIDDEN)

    node_out, edge_out = edge_node_forward(
        x_node, x_edge, (g_pack, w1_pack, w2_pack, bn_pack, rows_e_pad))
    jax.block_until_ready((node_out, edge_out))

    assert node_out.shape == (num_nodes, HIDDEN)
    assert edge_out.shape == (2 * E, HIDDEN)
    assert bool(jnp.all(jnp.isfinite(node_out)))
    assert bool(jnp.all(jnp.isfinite(edge_out)))

    # Cross-check against the plain-JAX reference (same bf16-rounded weights).
    node_ref, edge_ref = reference_forward(x_node, x_edge, gmats_raw, weights_raw)
    np.testing.assert_allclose(np.asarray(node_out), np.asarray(node_ref),
                               rtol=1e-2, atol=1e-2)
    np.testing.assert_allclose(np.asarray(edge_out), np.asarray(edge_ref),
                               rtol=1e-2, atol=1e-2)

    print("KERNEL_OK")
</pallas_src>

<mosaic_0001>
module attributes {stable_mosaic.version = 11 : i64} {
  func.func @kernel(%arg0: memref<8x32xf32, #tpu.memory_space<vmem>>, %arg1: memref<20x32xf32, #tpu.memory_space<vmem>>, %arg2: memref<72x32xbf16, #tpu.memory_space<vmem>>, %arg3: memref<128x128xbf16, #tpu.memory_space<vmem>>, %arg4: memref<64x64xbf16, #tpu.memory_space<vmem>>, %arg5: memref<8x64xf32, #tpu.memory_space<vmem>>, %arg6: memref<32x32xf32, #tpu.memory_space<vmem>>) attributes {dimension_semantics = [], scalar_prefetch = 0 : i64, scratch_operands = 0 : i64, tpu.core_type = #tpu.core_type<tc>} {
    %c0 = arith.constant 0 : index
    %c0_0 = arith.constant 0 : index
    %0 = vector.load %arg0[%c0, %c0_0] : memref<8x32xf32, #tpu.memory_space<vmem>>, vector<8x32xf32>
    %c0_1 = arith.constant 0 : index
    %c0_2 = arith.constant 0 : index
    %1 = vector.load %arg1[%c0_1, %c0_2] : memref<20x32xf32, #tpu.memory_space<vmem>>, vector<20x32xf32>
    %c0_3 = arith.constant 0 : index
    %c0_4 = arith.constant 0 : index
    %2 = vector.load %arg5[%c0_3, %c0_4] : memref<8x64xf32, #tpu.memory_space<vmem>>, vector<8x64xf32>
    %cst = arith.constant 0.000000e+00 : f32
    %3 = vector.broadcast %cst : f32 to vector<4x32xf32>
    %4 = tpu.concatenate %0, %1, %3 in 0 : vector<8x32xf32>, vector<20x32xf32>, vector<4x32xf32> -> vector<32x32xf32>
    %c0_5 = arith.constant 0 : index
    %c0_6 = arith.constant 0 : index
    %5 = vector.load %arg2[%c0_5, %c0_6] : memref<72x32xbf16, #tpu.memory_space<vmem>>, vector<72x32xbf16>
    %6 = arith.extf %5 : vector<72x32xbf16> to vector<72x32xf32>
    %cst_7 = arith.constant dense<0.000000e+00> : vector<72x32xf32>
    %7 = tpu.matmul %6, %4, %cst_7 {dimension_numbers = #tpu.dot_dimension_numbers<[1], [0], [0], [1], [0, 0, 1, 1], [], []>} : vector<72x32xf32>, vector<32x32xf32>, vector<72x32xf32> -> vector<72x32xf32>
    %8 = vector.extract_strided_slice %7 {offsets = [0, 0], sizes = [24, 32], strides = [1, 1]} : vector<72x32xf32> to vector<24x32xf32>
    %9 = vector.extract_strided_slice %7 {offsets = [24, 0], sizes = [24, 32], strides = [1, 1]} : vector<72x32xf32> to vector<24x32xf32>
    %10 = vector.extract_strided_slice %7 {offsets = [48, 0], sizes = [8, 32], strides = [1, 1]} : vector<72x32xf32> to vector<8x32xf32>
    %11 = vector.extract_strided_slice %7 {offsets = [56, 0], sizes = [8, 32], strides = [1, 1]} : vector<72x32xf32> to vector<8x32xf32>
    %12 = vector.extract_strided_slice %7 {offsets = [64, 0], sizes = [8, 32], strides = [1, 1]} : vector<72x32xf32> to vector<8x32xf32>
    %13 = vector.extract_strided_slice %4 {offsets = [8, 0], sizes = [24, 32], strides = [1, 1]} : vector<32x32xf32> to vector<24x32xf32>
    %cst_8 = arith.constant 0.000000e+00 : f32
    %14 = vector.broadcast %cst_8 : f32 to vector<24x32xf32>
    %15 = tpu.concatenate %13, %8, %9, %14 in 1 : vector<24x32xf32>, vector<24x32xf32>, vector<24x32xf32>, vector<24x32xf32> -> vector<24x128xf32>
    %16 = tpu.concatenate %0, %12, %10, %11 in 1 : vector<8x32xf32>, vector<8x32xf32>, vector<8x32xf32>, vector<8x32xf32> -> vector<8x128xf32>
    %17 = tpu.concatenate %15, %16 in 0 : vector<24x128xf32>, vector<8x128xf32> -> vector<32x128xf32>
    %c0_9 = arith.constant 0 : index
    %c0_10 = arith.constant 0 : index
    %18 = vector.load %arg3[%c0_9, %c0_10] : memref<128x128xbf16, #tpu.memory_space<vmem>>, vector<128x128xbf16>
    %19 = arith.extf %18 : vector<128x128xbf16> to vector<128x128xf32>
    %cst_11 = arith.constant dense<0.000000e+00> : vector<32x128xf32>
    %20 = tpu.matmul %17, %19, %cst_11 {dimension_numbers = #tpu.dot_dimension_numbers<[1], [0], [0], [1], [0, 0, 1, 1], [], []>} : vector<32x128xf32>, vector<128x128xf32>, vector<32x128xf32> -> vector<32x128xf32>
    %21 = tpu.iota {dimensions = array<i32: 0>} : vector<24x64xi32>
    %c20_i32 = arith.constant 20 : i32
    %22 = vector.broadcast %c20_i32 : i32 to vector<24x64xi32>
    %23 = arith.cmpi slt, %21, %22 : vector<24x64xi32>
    %24 = arith.extui %23 : vector<24x64xi1> to vector<24x64xi32>
    %25 = arith.sitofp %24 : vector<24x64xi32> to vector<24x64xf32>
    %26 = vector.extract_strided_slice %25 {offsets = [0, 0], sizes = [24, 32], strides = [1, 1]} : vector<24x64xf32> to vector<24x32xf32>
    %27 = vector.extract_strided_slice %20 {offsets = [0, 0], sizes = [24, 64], strides = [1, 1]} : vector<32x128xf32> to vector<24x64xf32>
    %28 = vector.extract_strided_slice %2 {offsets = [0, 0], sizes = [1, 64], strides = [1, 1]} : vector<8x64xf32> to vector<1x64xf32>
    %29 = vector.extract_strided_slice %2 {offsets = [1, 0], sizes = [1, 64], strides = [1, 1]} : vector<8x64xf32> to vector<1x64xf32>
    %cst_12 = arith.constant dense<0.000000e+00> : vector<64xf32>
    %30 = vector.multi_reduction <add>, %27, %cst_12 [0] : vector<24x64xf32> to vector<64xf32>
    %31 = vector.shape_cast %30 : vector<64xf32> to vector<1x64xf32>
    %cst_13 = arith.constant 5.000000e-02 : f32
    %32 = vector.broadcast %cst_13 : f32 to vector<1x64xf32>
    %33 = arith.mulf %31, %32 : vector<1x64xf32>
    %34 = vector.broadcast %33 : vector<1x64xf32> to vector<24x64xf32>
    %35 = arith.subf %27, %34 : vector<24x64xf32>
    %36 = arith.mulf %35, %25 : vector<24x64xf32>
    %37 = arith.mulf %36, %36 : vector<24x64xf32>
    %cst_14 = arith.constant dense<0.000000e+00> : vector<64xf32>
    %38 = vector.multi_reduction <add>, %37, %cst_14 [0] : vector<24x64xf32> to vector<64xf32>
    %39 = vector.shape_cast %38 : vector<64xf32> to vector<1x64xf32>
    %cst_15 = arith.constant 5.000000e-02 : f32
    %40 = vector.broadcast %cst_15 : f32 to vector<1x64xf32>
    %41 = arith.mulf %39, %40 : vector<1x64xf32>
    %cst_16 = arith.constant 9.99999974E-6 : f32
    %42 = vector.broadcast %cst_16 : f32 to vector<1x64xf32>
    %43 = arith.addf %41, %42 : vector<1x64xf32>
    %44 = math.rsqrt %43 : vector<1x64xf32>
    %45 = arith.mulf %28, %44 : vector<1x64xf32>
    %46 = arith.mulf %33, %45 : vector<1x64xf32>
    %47 = arith.subf %29, %46 : vector<1x64xf32>
    %48 = vector.broadcast %45 : vector<1x64xf32> to vector<24x64xf32>
    %49 = arith.mulf %27, %48 : vector<24x64xf32>
    %50 = vector.broadcast %47 : vector<1x64xf32> to vector<24x64xf32>
    %51 = arith.addf %49, %50 : vector<24x64xf32>
    %cst_17 = arith.constant 0.000000e+00 : f32
    %52 = vector.broadcast %cst_17 : f32 to vector<24x64xf32>
    %53 = arith.maximumf %51, %52 : vector<24x64xf32>
    %54 = vector.extract_strided_slice %20 {offsets = [24, 64], sizes = [8, 64], strides = [1, 1]} : vector<32x128xf32> to vector<8x64xf32>
    %55 = vector.extract_strided_slice %2 {offsets = [2, 0], sizes = [1, 64], strides = [1, 1]} : vector<8x64xf32> to vector<1x64xf32>
    %56 = vector.extract_strided_slice %2 {offsets = [3, 0], sizes = [1, 64], strides = [1, 1]} : vector<8x64xf32> to vector<1x64xf32>
    %cst_18 = arith.constant dense<0.000000e+00> : vector<64xf32>
    %57 = vector.multi_reduction <add>, %54, %cst_18 [0] : vector<8x64xf32> to vector<64xf32>
    %58 = vector.shape_cast %57 : vector<64xf32> to vector<1x64xf32>
    %cst_19 = arith.constant 1.250000e-01 : f32
    %59 = vector.broadcast %cst_19 : f32 to vector<1x64xf32>
    %60 = arith.mulf %58, %59 : vector<1x64xf32>
    %61 = vector.broadcast %60 : vector<1x64xf32> to vector<8x64xf32>
    %62 = arith.subf %54, %61 : vector<8x64xf32>
    %63 = arith.mulf %62, %62 : vector<8x64xf32>
    %cst_20 = arith.constant dense<0.000000e+00> : vector<64xf32>
    %64 = vector.multi_reduction <add>, %63, %cst_20 [0] : vector<8x64xf32> to vector<64xf32>
    %65 = vector.shape_cast %64 : vector<64xf32> to vector<1x64xf32>
    %cst_21 = arith.constant 1.250000e-01 : f32
    %66 = vector.broadcast %cst_21 : f32 to vector<1x64xf32>
    %67 = arith.mulf %65, %66 : vector<1x64xf32>
    %cst_22 = arith.constant 9.99999974E-6 : f32
    %68 = vector.broadcast %cst_22 : f32 to vector<1x64xf32>
    %69 = arith.addf %67, %68 : vector<1x64xf32>
    %70 = math.rsqrt %69 : vector<1x64xf32>
    %71 = arith.mulf %55, %70 : vector<1x64xf32>
    %72 = arith.mulf %60, %71 : vector<1x64xf32>
    %73 = arith.subf %56, %72 : vector<1x64xf32>
    %74 = vector.broadcast %71 : vector<1x64xf32> to vector<8x64xf32>
    %75 = arith.mulf %54, %74 : vector<8x64xf32>
    %76 = vector.broadcast %73 : vector<1x64xf32> to vector<8x64xf32>
    %77 = arith.addf %75, %76 : vector<8x64xf32>
    %cst_23 = arith.constant 0.000000e+00 : f32
    %78 = vector.broadcast %cst_23 : f32 to vector<8x64xf32>
    %79 = arith.maximumf %77, %78 : vector<8x64xf32>
    %80 = arith.mulf %53, %25 : vector<24x64xf32>
    %81 = tpu.concatenate %80, %79 in 0 : vector<24x64xf32>, vector<8x64xf32> -> vector<32x64xf32>
    %c0_24 = arith.constant 0 : index
    %c0_25 = arith.constant 0 : index
    %82 = vector.load %arg4[%c0_24, %c0_25] : memref<64x64xbf16, #tpu.memory_space<vmem>>, vector<64x64xbf16>
    %83 = arith.extf %82 : vector<64x64xbf16> to vector<64x64xf32>
    %cst_26 = arith.constant dense<0.000000e+00> : vector<32x64xf32>
    %84 = tpu.matmul %81, %83, %cst_26 {dimension_numbers = #tpu.dot_dimension_numbers<[1], [0], [0], [1], [0, 0, 1, 1], [], []>} : vector<32x64xf32>, vector<64x64xf32>, vector<32x64xf32> -> vector<32x64xf32>
    %85 = vector.extract_strided_slice %84 {offsets = [0, 0], sizes = [24, 32], strides = [1, 1]} : vector<32x64xf32> to vector<24x32xf32>
    %86 = vector.extract_strided_slice %2 {offsets = [4, 0], sizes = [1, 32], strides = [1, 1]} : vector<8x64xf32> to vector<1x32xf32>
    %87 = vector.extract_strided_slice %2 {offsets = [5, 0], sizes = [1, 32], strides = [1, 1]} : vector<8x64xf32> to vector<1x32xf32>
    %cst_27 = arith.constant dense<0.000000e+00> : vector<32xf32>
    %88 = vector.multi_reduction <add>, %85, %cst_27 [0] : vector<24x32xf32> to vector<32xf32>
    %89 = vector.shape_cast %88 : vector<32xf32> to vector<1x32xf32>
    %cst_28 = arith.constant 5.000000e-02 : f32
    %90 = vector.broadcast %cst_28 : f32 to vector<1x32xf32>
    %91 = arith.mulf %89, %90 : vector<1x32xf32>
    %92 = vector.broadcast %91 : vector<1x32xf32> to vector<24x32xf32>
    %93 = arith.subf %85, %92 : vector<24x32xf32>
    %94 = arith.mulf %93, %26 : vector<24x32xf32>
    %95 = arith.mulf %94, %94 : vector<24x32xf32>
    %cst_29 = arith.constant dense<0.000000e+00> : vector<32xf32>
    %96 = vector.multi_reduction <add>, %95, %cst_29 [0] : vector<24x32xf32> to vector<32xf32>
    %97 = vector.shape_cast %96 : vector<32xf32> to vector<1x32xf32>
    %cst_30 = arith.constant 5.000000e-02 : f32
    %98 = vector.broadcast %cst_30 : f32 to vector<1x32xf32>
    %99 = arith.mulf %97, %98 : vector<1x32xf32>
    %cst_31 = arith.constant 9.99999974E-6 : f32
    %100 = vector.broadcast %cst_31 : f32 to vector<1x32xf32>
    %101 = arith.addf %99, %100 : vector<1x32xf32>
    %102 = math.rsqrt %101 : vector<1x32xf32>
    %103 = arith.mulf %86, %102 : vector<1x32xf32>
    %104 = arith.mulf %91, %103 : vector<1x32xf32>
    %105 = arith.subf %87, %104 : vector<1x32xf32>
    %106 = vector.broadcast %103 : vector<1x32xf32> to vector<24x32xf32>
    %107 = arith.mulf %85, %106 : vector<24x32xf32>
    %108 = vector.broadcast %105 : vector<1x32xf32> to vector<24x32xf32>
    %109 = arith.addf %107, %108 : vector<24x32xf32>
    %cst_32 = arith.constant 0.000000e+00 : f32
    %110 = vector.broadcast %cst_32 : f32 to vector<24x32xf32>
    %111 = arith.maximumf %109, %110 : vector<24x32xf32>
    %112 = vector.extract_strided_slice %84 {offsets = [24, 32], sizes = [8, 32], strides = [1, 1]} : vector<32x64xf32> to vector<8x32xf32>
    %113 = vector.extract_strided_slice %2 {offsets = [6, 0], sizes = [1, 32], strides = [1, 1]} : vector<8x64xf32> to vector<1x32xf32>
    %114 = vector.extract_strided_slice %2 {offsets = [7, 0], sizes = [1, 32], strides = [1, 1]} : vector<8x64xf32> to vector<1x32xf32>
    %cst_33 = arith.constant dense<0.000000e+00> : vector<32xf32>
    %115 = vector.multi_reduction <add>, %112, %cst_33 [0] : vector<8x32xf32> to vector<32xf32>
    %116 = vector.shape_cast %115 : vector<32xf32> to vector<1x32xf32>
    %cst_34 = arith.constant 1.250000e-01 : f32
    %117 = vector.broadcast %cst_34 : f32 to vector<1x32xf32>
    %118 = arith.mulf %116, %117 : vector<1x32xf32>
    %119 = vector.broadcast %118 : vector<1x32xf32> to vector<8x32xf32>
    %120 = arith.subf %112, %119 : vector<8x32xf32>
    %121 = arith.mulf %120, %120 : vector<8x32xf32>
    %cst_35 = arith.constant dense<0.000000e+00> : vector<32xf32>
    %122 = vector.multi_reduction <add>, %121, %cst_35 [0] : vector<8x32xf32> to vector<32xf32>
    %123 = vector.shape_cast %122 : vector<32xf32> to vector<1x32xf32>
    %cst_36 = arith.constant 1.250000e-01 : f32
    %124 = vector.broadcast %cst_36 : f32 to vector<1x32xf32>
    %125 = arith.mulf %123, %124 : vector<1x32xf32>
    %cst_37 = arith.constant 9.99999974E-6 : f32
    %126 = vector.broadcast %cst_37 : f32 to vector<1x32xf32>
    %127 = arith.addf %125, %126 : vector<1x32xf32>
    %128 = math.rsqrt %127 : vector<1x32xf32>
    %129 = arith.mulf %113, %128 : vector<1x32xf32>
    %130 = arith.mulf %118, %129 : vector<1x32xf32>
    %131 = arith.subf %114, %130 : vector<1x32xf32>
    %132 = vector.broadcast %129 : vector<1x32xf32> to vector<8x32xf32>
    %133 = arith.mulf %112, %132 : vector<8x32xf32>
    %134 = vector.broadcast %131 : vector<1x32xf32> to vector<8x32xf32>
    %135 = arith.addf %133, %134 : vector<8x32xf32>
    %cst_38 = arith.constant 0.000000e+00 : f32
    %136 = vector.broadcast %cst_38 : f32 to vector<8x32xf32>
    %137 = arith.maximumf %135, %136 : vector<8x32xf32>
    %138 = arith.mulf %111, %26 : vector<24x32xf32>
    %139 = tpu.concatenate %138, %137 in 0 : vector<24x32xf32>, vector<8x32xf32> -> vector<32x32xf32>
    %c0_39 = arith.constant 0 : index
    %c0_40 = arith.constant 0 : index
    %140 = vector.load %arg6[%c0_39, %c0_40] : memref<32x32xf32, #tpu.memory_space<vmem>>, vector<32x32xf32>
    tpu.vector_store %arg6[%c0_39, %c0_40], %139 {strides = array<i32>} : memref<32x32xf32, #tpu.memory_space<vmem>>, vector<32x32xf32>,
    return
  }
}

</mosaic_0001>

<bundles_post_ra>
// kernel: tpu_custom_call.1
= control target key start
LH: loop header
LB: loop body
LE: loop exit
PB: predicated region body
PF: predicated region fallthrough
CT: control target
= control target key end

     0   :  { %11 = vsyncpa [#allocation3], 0  ;;  %s1462_s0 = inlined_call_operand.hbm [shape: f32[8,32], index: 0, kind: input, shape index: {}]   ;;  %s1463_s1 = inlined_call_operand.vmem [shape: f32[20,32], index: 1, kind: input, shape index: {}]   ;;  %s1464_s2 = inlined_call_operand.vmem [shape: bf16[72,32], index: 2, kind: input, shape index: {}]   ;;  %s1465_s3 = inlined_call_operand.hbm [shape: bf16[128,128], index: 3, kind: input, shape index: {}]   ;;  %s1466_s4 = inlined_call_operand.vmem [shape: bf16[64,64], index: 4, kind: input, shape index: {}]   ;;  %s1467_s5 = inlined_call_operand.vmem [shape: f32[8,64], index: 5, kind: input, shape index: {}]   ;;  %s1468_s6 = inlined_call_operand.hbm [shape: f32[32,32], index: 6, kind: output, shape index: {}]  }
   0x1   :  { %12 = vsyncpa [#allocation6], 0 }
   0x2   :  { %13 = vsyncpa [#allocation4], 0  ;;  %s1157_s21 = smov [#allocation2]   ;;  %s1158_s23 = smov [#allocation5]  }
   0x3   :  { %s20_s22 = sshll.u32 %s1157_s21, 4  ;;  %s33_s24 = sshll.u32 %s1158_s23, 4  ;;  %s21_s22 = int_to_ptr.vmem [resolvable:$true] %s20_s22  ;;  %s1205_s24 = int_to_ptr.vmem [resolvable:$true] %s33_s24 }
   0x4   :  { %s1085_s27 = scalar_lea.hbm %s1462_s0, 128 }
   0x5   :  { %p1086_p0 = scmp.ne.s32.totalorder %s1462_s0, %s1085_s27  ;;  %p1089_p1 = scmp.lt.u32.totalorder %s1085_s27, %s1462_s0 }
   0x7   :  { %p1091_p2 = pnand %p1089_p1, %p1086_p0 }
   0x9   :  { %1094 = shalt.err (!%p1091_p2)
}
   0xa   :  { %s1095_s8 = scalar_lea.vmem %s21_s22, 128  ;;  %p1100_p4 = scmp.lt.s32.totalorder %s21_s22, %s21_s22 }
   0xb   :  { %p1096_p3 = scmp.ne.s32.totalorder %s21_s22, %s1095_s8  ;;  %p1101_p5 = scmp.lt.s32.totalorder %s1095_s8, %s1095_s8 }
   0xd   :  { %p1102_p6 = por %p1101_p5, %p1100_p4 }
   0xf   :  { %p1103_p7 = pnand %p1102_p6, %p1096_p3 }
  0x11   :  { %1106 = shalt.err (!%p1103_p7)
}
  0x12   :  { %23 = dma.hbm_to_vmem [thread:$0]  %s1462_s0, 128, %s21_s22, [#allocation3]  }
  0x13   :  { %s1107_s13 = scalar_lea.hbm %s1465_s3, 1024 }
  0x14   :  { %p1108_p8 = scmp.ne.s32.totalorder %s1465_s3, %s1107_s13  ;;  %p1111_p9 = scmp.lt.u32.totalorder %s1107_s13, %s1465_s3 }
  0x16   :  { %p1113_p10 = pnand %p1111_p9, %p1108_p8 }
  0x18   :  { %1116 = shalt.err (!%p1113_p10)
}
  0x19   :  { %s1117_s18 = scalar_lea.vmem %s1205_s24, 1024  ;;  %p1122_p12 = scmp.lt.s32.totalorder %s1205_s24, %s1205_s24 }
  0x1a   :  { %p1118_p11 = scmp.ne.s32.totalorder %s1205_s24, %s1117_s18  ;;  %p1123_p13 = scmp.lt.s32.totalorder %s1117_s18, %s1117_s18 }
  0x1c   :  { %p1124_p0 = por %p1123_p13, %p1122_p12 }
  0x1e   :  { %p1125_p1 = pnand %p1124_p0, %p1118_p11 }
  0x20   :  { %1128 = shalt.err (!%p1125_p1)
}
  0x21   :  { %s1159_s0 = smov 64   ;;  %s1160_s19 = smov 4  }
  0x22   :  { %39 = dma.hbm_to_vmem [thread:$0]  %s1465_s3, 1024, %s1205_s24, [#allocation6], %s1159_s0, %s1159_s0, %s1160_s19  }
  0x23   :  { %1151 = dma.done.wait [#allocation3], 128  }
  0x24   :  { %1152 = vsyncadd [#allocation3], 4294967168 }
  0x25   :  { %1153 = dma.done.wait [#allocation6], 1024  }
  0x26   :  { %1154 = vsyncadd [#allocation6], 4294966272  ;;  %v1161_v0 = vmov 0.0|0.0   ;;  %vm1162_vm0 = vmmov 0   ;;  %v1163_v1 = vmov 0.0   ;;  %v1242_v2 = vld [vmem:[#allocation2] sm:$0xff] }
  0x27   :  { %1005 = vmatprep.subr.bf16.mxu0 %v1161_v0  ;;  %1060 = vmatprep.subr.bf16.mxu1 %v1161_v0  ;;  %v1247_v3 = vld [vmem:[%s1463_s1] sm:$0xff]  ;;  %v1252_v4 = vld [vmem:[%s1463_s1 + $0x8] sm:$0xff]  ;;  %v1259_v6 = vld [vmem:[%s1463_s1 + $0x10] sm:$0xf]  ;;  %vm55_vm1 = vcmask 1043456   ;;  %vm1164_vm2 = vmmov 1  }
  0x28   :  { %918 = vmatprep.mubr.msk.f32.mxu0 %vm1162_vm0, %v1163_v1  ;;  %930 = vmatprep.mubr.msk.f32.mxu1 %vm1162_vm0, %v1163_v1  ;;  %v1006_v5 = vpack.c.bf16 %v1247_v3, %v1242_v2  ;;  %v1009_v7 = vpack.c.bf16 %v1259_v6, %v1252_v4  ;;  %v789_v8 = vld [vmem:[%s1464_s2] sm:$0xff]   ;;  %v853_v9 = vld [vmem:[%s1464_s2 + $0x10] sm:$0xff]   ;;  %vm1010_vm3 = vmpackc.low %vm55_vm1, %vm1164_vm2  ;;  %vm75_vm4 = vcmask 261120   ;;  %s1166_s12 = smov 96   ;;  %v56_v52 = vsel %vm55_vm1, %v1259_v6, 0.0 }
  0x29   :  { %v790_v10 = vunpack.c.l.bf16 %v789_v8  ;;  %v798_v11 = vunpack.c.l.bf16 %v853_v9  ;;  %v791_v12 = vunpack.c.h.bf16 %v789_v8  ;;  %v799_v13 = vunpack.c.h.bf16 %v853_v9  ;;  %v852_v14 = vld [vmem:[%s1464_s2 + $0x8] sm:$0xff]   ;;  %v854_v15 = vld [vmem:[%s1464_s2 + $0x18] sm:$0xff]   ;;  %v65_v20 = vld [vmem:[%s1464_s2 + $0x20] sm:$0xf]  ;;  %s1165_s2 = smov 32  }
  0x2a   :  { %1007 = vmatpush3.bf16.msra.mxu0 %v1006_v5  ;;  %1062 = vmatpush3.bf16.msra.mxu1 %v1006_v5  ;;  %v794_v16 = vunpack.c.l.bf16 %v852_v14  ;;  %v802_v17 = vunpack.c.l.bf16 %v854_v15  ;;  %v795_v18 = vunpack.c.h.bf16 %v852_v14  ;;  %v803_v19 = vunpack.c.h.bf16 %v854_v15  ;;  %v805_v22 = vld [vmem:[#allocation5] sm:$0xff]   ;;  %v855_v23 = vld [vmem:[#allocation5 + $0x8] sm:$0xff]   ;;  %v856_v24 = vld [vmem:[#allocation5 + $0x10] sm:$0xff]  }
  0x2b   :  { %1008 = vmatprep.subr.bf16.mxu0 %v1161_v0  ;;  %1061 = vmatprep.subr.bf16.mxu1 %v1161_v0  ;;  %v74_v21 = vunpack.c.l.bf16 %v65_v20  ;;  %v857_v25 = vld [vmem:[#allocation5 + $0x18] sm:$0xff]   ;;  %v858_v26 = vld [vmem:[#allocation5 + $0x20] sm:$0xff]   ;;  %v859_v27 = vld [vmem:[#allocation5 + $0x28] sm:$0xff]   ;;  %vm240_vm5 = vcmask 523264   ;;  %vm244_vm6 = vcmask 785408   ;;  %vm451_vm7 = vcmask 1048064  }
  0x2c   :  { %v860_v28 = vld [vmem:[#allocation5 + $0x30] sm:$0xff]   ;;  %v861_v29 = vld [vmem:[#allocation5 + $0x38] sm:$0xff]   ;;  %v862_v6 = vld [vmem:[%s1466_s4 + $0x8] sm:$0xff]   ;;  %vm684_vm9 = vcmask 523520  }
  0x2d   :  { %v837_v5 = vld [vmem:[%s1466_s4] sm:$0xff]  }
  0x2e   :  { %1011 = vmatpush3.bf16.msk.msra.mxu0 %vm1010_vm3, %v1009_v7  ;;  %1063 = vmatpush3.bf16.msk.msra.mxu1 %vm1010_vm3, %v1009_v7  ;;  %v864_v7 = vld [vmem:[%s1466_s4 + $0x18] sm:$0xff]  }
  0x2f   :  { %1013 = vmatprep.subr.bf16.mxu1 %v805_v22  ;;  %1045 = vmatprep.subr.bf16.mxu0 %v837_v5 }
  0x31   :  { %919 = vmatmul.mubr.msk.f32.vlgmr.msra.gmra.mrb[0].mxu0 %vm75_vm4, %v790_v10  ;;  %931 = vmatmul.mubr.msk.f32.vlgmr.msra.gmra.mrb[0].mxu1 %vm75_vm4, %v798_v11 }
  0x32   :  { %921 = vmatprep.mubr.msk.f32.mxu0 %vm1162_vm0, %v1163_v1  ;;  %933 = vmatprep.mubr.msk.f32.mxu1 %vm1162_vm0, %v1163_v1 }
  0x33   :  { %1015 = vmatpush3.bf16.msra.mxu1 %v805_v22  ;;  %1047 = vmatpush3.bf16.msra.mxu0 %v837_v5  ;;  %v1378_v5 = vld [vmem:[%s1467_s5] sm:$0xff]  ;;  %s1167_s5 = smov [#allocation7]  }
  0x34   :  { %1017 = vmatprep.subr.bf16.mxu1 %v855_v23  ;;  %1049 = vmatprep.subr.bf16.mxu0 %v862_v6 }
  0x35   :  { %922 = vmatmul.mubr.msk.f32.gmra.mrb[2].mxu0 %vm75_vm4, %v791_v12  ;;  %934 = vmatmul.mubr.msk.f32.gmra.mrb[2].mxu1 %vm75_vm4, %v799_v13 }
  0x36   :  { %924 = vmatprep.mubr.msk.f32.mxu0 %vm1162_vm0, %v1163_v1  ;;  %936 = vmatprep.mubr.msk.f32.mxu1 %vm1162_vm0, %v1163_v1 }
  0x37   :  { %1019 = vmatpush3.bf16.msra.mxu1 %v855_v23  ;;  %1051 = vmatpush3.bf16.msra.mxu0 %v862_v6 }
  0x38   :  { %1021 = vmatprep.subr.bf16.mxu1 %v856_v24 }
  0x39   :  { %925 = vmatmul.mubr.msk.f32.gmra.mrb[4].mxu0 %vm75_vm4, %v794_v16  ;;  %937 = vmatmul.mubr.msk.f32.gmra.mrb[4].mxu1 %vm75_vm4, %v802_v17 }
  0x3a   :  { %927 = vmatprep.mubr.msk.f32.mxu0 %vm1162_vm0, %v1163_v1  ;;  %939 = vmatprep.mubr.msk.f32.mxu1 %vm1162_vm0, %v1163_v1 }
  0x3b   :  { %1023 = vmatpush3.bf16.msra.mxu1 %v856_v24 }
  0x3c   :  { %1025 = vmatprep.subr.bf16.mxu1 %v857_v25 }
  0x3d   :  { %928 = vmatmul.mubr.msk.f32.gmra.mrb[6].mxu0 %vm75_vm4, %v795_v18  ;;  %940 = vmatmul.mubr.msk.f32.gmra.mrb[6].mxu1 %vm75_vm4, %v803_v19  ;;  %v380_v18 = vlaneseq }
  0x3e   :  { %942 = vmatprep.mubr.msk.f32.mxu1 %vm1162_vm0, %v1163_v1 }
  0x3f   :  { %1027 = vmatpush3.bf16.msra.mxu1 %v857_v25  ;;  %v1356_v23 = vshrl.u32 %v380_v18, 7 }
  0x40   :  { %1029 = vmatprep.subr.bf16.mxu1 %v858_v26 }
  0x41   :  { %943 = vmatmul.mubr.msk.f32.gmra.mrb[8].mxu1 %vm75_vm4, %v74_v21  ;;  %v436_v6 = vsub.s32 0, %v1356_v23 }
  0x43   :  { %1031 = vmatpush3.bf16.msra.mxu1 %v858_v26 }
  0x44   :  { %1033 = vmatprep.subr.bf16.mxu1 %v859_v27 }
  0x47   :  { %1035 = vmatpush3.bf16.msra.mxu1 %v859_v27 }
  0x48   :  { %1037 = vmatprep.subr.bf16.mxu1 %v860_v28 }
  0x4b   :  { %1039 = vmatpush3.bf16.msra.mxu1 %v860_v28  ;;  %v383_v28 = vadd.s32 16, %v1356_v23 }
  0x4c   :  { %1041 = vmatprep.subr.bf16.mxu1 %v861_v29 }
  0x4d   :  { %vm386_vm8 = vcmp.lt.s32.totalorder %v383_v28, 20 }
  0x4f   :  { %1043 = vmatpush3.bf16.msra.mxu1 %v861_v29 }
 0x104   :  { %v169_v30 = vpop.f32.mrb[0].mxu0  ;;  %v189_v31 = vpop.f32.mrb[0].mxu1 }
 0x105   :  { %230 = vrot.lane.b32.xlu1 %v189_v31, %s1159_s0  ;;  %v932_v32 = vpop.f32.mrb[1].mxu1  ;;  %216 = vrot.lane.b32.xlu0 %v169_v30, %s1165_s2  ;;  %v920_v33 = vpop.f32.mrb[1].mxu0 }
 0x108   :  { %v174_v34 = vpop.f32.mrb[2].mxu0  ;;  %v194_v35 = vpop.f32.mrb[2].mxu1 }
 0x109   :  { %v935_v36 = vpop.f32.mrb[3].mxu1  ;;  %218 = vrot.lane.b32.xlu0 %v174_v34, %s1165_s2  ;;  %v923_v37 = vpop.f32.mrb[3].mxu0 }
 0x10a   :  { %v1364_v37 = vsel %vm386_vm8, 1.0, %v1163_v1 }
 0x10c   :  { %v179_v38 = vpop.f32.mrb[4].mxu0  ;;  %v199_v39 = vpop.f32.mrb[4].mxu1 }
 0x10d   :  { %v938_v40 = vpop.f32.mrb[5].mxu1  ;;  %232 = vrot.lane.b32.xlu0 %v194_v35, %s1159_s0  ;;  %v926_v41 = vpop.f32.mrb[5].mxu0 }
 0x110   :  { %v184_v42 = vpop.f32.mrb[6].mxu0  ;;  %v204_v43 = vpop.f32.mrb[6].mxu1 }
 0x111   :  { %v941_v44 = vpop.f32.mrb[7].mxu1  ;;  %220 = vrot.lane.b32.xlu0 %v179_v38, %s1165_s2  ;;  %228 = vrot.lane.b32.xlu1 %v184_v42, %s1159_s0  ;;  %v929_v45 = vpop.f32.mrb[7].mxu0 }
 0x114   :  { %v209_v46 = vpop.f32.mrb[8].mxu1 }
 0x115   :  { %v944_v47 = vpop.f32.mrb[9].mxu1  ;;  %257 = vrot.lane.b32.xlu0 %v204_v43, %s1166_s12  ;;  %249 = vrot.lane.b32.xlu1 %v209_v46, %s1165_s2 }
 0x119   :  { %253 = vrot.lane.b32.xlu1 %v199_v39, %s1159_s0 }
 0x177   :  { %v217_v48 = vpop.permute.xlu0 %216  ;;  %v231_v50 = vpop.permute.xlu1 %230 }
 0x178   :  { %v237_v54 = vsel %vm75_vm4, %v1247_v3, %v217_v48 }
 0x17b   :  { %v219_v49 = vpop.permute.xlu0 %218 }
 0x17c   :  { %v238_v53 = vsel %vm75_vm4, %v1252_v4, %v219_v49 }
 0x17d   :  { %v242_v59 = vsel %vm240_vm5, %v238_v53, %v231_v50 }
 0x17f   :  { %v233_v51 = vpop.permute.xlu0 %232 }
 0x183   :  { %v221_v55 = vpop.permute.xlu0 %220  ;;  %v229_v56 = vpop.permute.xlu1 %228 }
 0x184   :  { %v239_v57 = vsel %vm75_vm4, %v56_v52, %v221_v55  ;;  %v241_v58 = vsel %vm240_vm5, %v237_v54, %v229_v56 }
 0x185   :  { %977 = vmatprep.mubr.msk.f32.mxu1 %vm244_vm6, %v241_v58  ;;  %v243_v60 = vsel %vm240_vm5, %v239_v57, %v233_v51 }
 0x186   :  { %978 = vmatmul.mubr.msk.f32.vlgmr.msra.gmra.mrb[10].mxu1 %vm244_vm6, %v242_v59 }
 0x187   :  { %980 = vmatprep.mubr.msk.f32.mxu1 %vm244_vm6, %v243_v60  ;;  %v250_v61 = vpop.permute.xlu1 %249  ;;  %v258_v0 = vpop.permute.xlu0 %257 }
 0x188   :  { %v260_v62 = vsel %vm75_vm4, %v1242_v2, %v250_v61  ;;  %v863_v2 = vld [vmem:[%s1466_s4 + $0x10] sm:$0xff]  }
 0x189   :  { %1053 = vmatprep.subr.bf16.mxu0 %v863_v2 }
 0x18a   :  { %1055 = vmatpush3.bf16.msra.mxu0 %v863_v2 }
 0x18b   :  { %v254_v63 = vpop.permute.xlu1 %253  ;;  %1057 = vmatprep.subr.bf16.mxu0 %v864_v7 }
 0x18c   :  { %v261_v3 = vsel %vm240_vm5, %v260_v62, %v254_v63 }
 0x18d   :  { %v262_v4 = vsel %vm244_vm6, %v261_v3, %v258_v0 }
 0x18e   :  { %981 = vmatmul.mubr.f32.gmra.mrb[12].mxu1 %v262_v4  ;;  %1059 = vmatpush3.bf16.msra.mxu0 %v864_v7 }
 0x259   :  { %v1340_v8 = vpop.f32.mrb[10].mxu1 }
 0x25a   :  { %v394_v9 = vsel %vm240_vm5, %v1340_v8, 0.0  ;;  %v1344_v10 = vpop.f32.mrb[11].mxu1 }
 0x25b   :  { %v393_v11 = vsel %vm240_vm5, %v1344_v10, 0.0 }
 0x25c   :  { %v395_v12 = vadd.f32 %v394_v9, %v393_v11 }
 0x261   :  { %v1348_v13 = vpop.f32.mrb[12].mxu1 }
 0x262   :  { %v452_v14 = vsel %vm451_vm7, %v1348_v13, 0.0  ;;  %v1352_v15 = vpop.f32.mrb[13].mxu1 }
 0x263   :  { %v453_v16 = vrot.slane %v452_v14, 4  ;;  %v396_v17 = vsel %vm240_vm5, %v1352_v15, 0.0 }
 0x264   :  { %v397_v19 = vadd.f32 %v396_v17, %v395_v12  ;;  %v443_v12 = vsub.s32 1, %v1356_v23 }
 0x265   :  { %v454_v20 = vadd.f32 %v453_v16, %v452_v14 }
 0x266   :  { %v398_v21 = vrot.slane %v397_v19, 4 }
 0x267   :  { %v455_v22 = vrot.slane %v454_v20, 2 }
 0x268   :  { %v399_v24 = vadd.f32 %v398_v21, %v397_v19 }
 0x269   :  { %v456_v25 = vadd.f32 %v455_v22, %v454_v20 }
 0x26a   :  { %v400_v26 = vrot.slane %v399_v24, 2 }
 0x26b   :  { %v457_v27 = vrot.slane %v456_v25, 1 }
 0x26c   :  { %v401_v29 = vadd.f32 %v400_v26, %v399_v24 }
 0x26d   :  { %v458_v30 = vadd.f32 %v457_v27, %v456_v25 }
 0x26e   :  { %v402_v31 = vrot.slane %v401_v29, 1 }
 0x26f   :  { %v1359_v32 = vmul.f32 0.125, %v458_v30 }
 0x270   :  { %v403_v33 = vadd.f32 %v402_v31, %v401_v29  ;;  %v491_v29 = vsub.s32 2, %v1356_v23 }
 0x271   :  { %v460_v34 = vsub.f32 %v1348_v13, %v1359_v32 }
 0x272   :  { %v404_v35 = vmul.f32 0.05, %v403_v33 }
 0x273   :  { %v461_v36 = vmul.f32 %v460_v34, %v460_v34 }
 0x274   :  { %v405_v38 = vsub.f32 %v1344_v10, %v404_v35  ;;  %v406_v39 = vsub.f32 %v1340_v8, %v404_v35  ;;  %v407_v40 = vsub.f32 %v1352_v15, %v404_v35 }
 0x275   :  { %v462_v41 = vsel %vm451_vm7, %v461_v36, 0.0 }
 0x276   :  { %v463_v42 = vrot.slane %v462_v41, 4  ;;  %v410_v43 = vmul.f32 %v1364_v37, %v407_v40  ;;  %v411_v44 = vmul.f32 %v405_v38, %v405_v38  ;;  %v412_v45 = vmul.f32 %v406_v39, %v406_v39 }
 0x278   :  { %v464_v46 = vadd.f32 %v463_v42, %v462_v41  ;;  %v413_v47 = vmul.f32 %v410_v43, %v410_v43  ;;  %v414_v48 = vsel %vm240_vm5, %v411_v44, 0.0  ;;  %v415_v1 = vsel %vm240_vm5, %v412_v45, 0.0 }
 0x279   :  { %v416_v49 = vadd.f32 %v415_v1, %v414_v48  ;;  %v500_v41 = vsub.s32 3, %v1356_v23 }
 0x27a   :  { %v465_v50 = vrot.slane %v464_v46, 2  ;;  %v417_v51 = vsel %vm240_vm5, %v413_v47, 0.0 }
 0x27b   :  { %v418_v52 = vadd.f32 %v417_v51, %v416_v49 }
 0x27c   :  { %v466_v53 = vadd.f32 %v465_v50, %v464_v46 }
 0x27d   :  { %v419_v54 = vrot.slane %v418_v52, 4 }
 0x27e   :  { %v467_v55 = vrot.slane %v466_v53, 1 }
 0x27f   :  { %v420_v56 = vadd.f32 %v419_v54, %v418_v52 }
 0x280   :  { %v468_v57 = vadd.f32 %v467_v55, %v466_v53 }
 0x281   :  { %v421_v58 = vrot.slane %v420_v56, 2 }
 0x282   :  { %v469_v59 = vmul.f32 0.125, %v468_v57 }
 0x283   :  { %v422_v60 = vadd.f32 %v421_v58, %v420_v56 }
 0x284   :  { %v470_v61 = vadd.f32 1e-05, %v469_v59 }
 0x285   :  { %v423_v62 = vrot.slane %v422_v60, 1 }
 0x286   :  { %1077 = vrsqrt.f32 %v470_v61 }
 0x287   :  { %v424_v63 = vadd.f32 %v423_v62, %v422_v60 }
 0x289   :  { %v425_v0 = vmul.f32 0.05, %v424_v63 }
 0x28b   :  { %v426_v3 = vadd.f32 1e-05, %v425_v0 }
 0x28d   :  { %1079 = vrsqrt.f32 %v426_v3 }
 0x290   :  { %v1078_v4 = vpop.eup %1077 }
 0x291   :  { %473 = vrot.lane.b32.xlu1 %v1078_v4, %s1159_s0 }
 0x297   :  { %v1080_v2 = vpop.eup %1079 }
 0x298   :  { %v428_v7 = vmul.f32 %v1080_v2, %v1378_v5 }
 0x29a   :  { %v429_v9 = vmul.f32 %v428_v7, %v404_v35  ;;  %v437_v11 = vrot.slane %v428_v7, %v436_v6 }
 0x29c   :  { %v431_v14 = vrot.slane %v429_v9, 7  ;;  %v439_v16 = vmul.f32 %v1340_v8, %v437_v11  ;;  %v440_v17 = vmul.f32 %v437_v11, %v1352_v15  ;;  %v438_v18 = vmul.f32 %v437_v11, %v1344_v10 }
 0x29e   :  { %v433_v19 = vsub.f32 %v1378_v5, %v431_v14 }
 0x2a0   :  { %v444_v20 = vrot.slane %v433_v19, %v443_v12 }
 0x2a2   :  { %v446_v21 = vadd.f32 %v444_v20, %v439_v16  ;;  %v447_v22 = vadd.f32 %v444_v20, %v440_v17  ;;  %v445_v24 = vadd.f32 %v444_v20, %v438_v18 }
 0x2a4   :  { %v449_v25 = vmax.f32 %v446_v21, 0.0  ;;  %v450_v26 = vmax.f32 %v447_v22, 0.0  ;;  %v448_v27 = vmax.f32 %v445_v24, 0.0 }
 0x2a6   :  { %v510_v28 = vmul.f32 %v1364_v37, %v450_v26  ;;  %999 = vmatprep.mubr.msk.f32.mxu0 %vm240_vm5, %v448_v27 }
 0x2a7   :  { %1000 = vmatmul.mubr.msk.f32.vlgmr.msra.gmra.mrb[8].mxu0 %vm240_vm5, %v449_v25 }
 0x2a8   :  { %1002 = vmatprep.mubr.msk.f32.mxu0 %vm240_vm5, %v510_v28 }
 0x303   :  { %v474_v8 = vpop.permute.xlu1 %473 }
 0x304   :  { %v476_v10 = vmul.f32 %v474_v8, %v1378_v5 }
 0x306   :  { %v478_v15 = vrot.slane %v476_v10, 2  ;;  %v492_v30 = vrot.slane %v476_v10, %v491_v29 }
 0x308   :  { %479 = vrot.lane.b32.xlu0 %v478_v15, %s1159_s0 }
 0x30c   :  { %494 = vrot.lane.b32.xlu0 %v492_v30, %s1159_s0 }
 0x37a   :  { %v480_v31 = vpop.permute.xlu0 %479  ;;  %v1395_v33 = vpop.f32.mrb[8].mxu0 }
 0x37b   :  { %v482_v34 = vmul.f32 %v480_v31, %v1359_v32  ;;  %v627_v35 = vsel %vm75_vm4, %v1395_v33, 0.0  ;;  %v1400_v36 = vpop.f32.mrb[9].mxu0 }
 0x37c   :  { %v626_v38 = vsel %vm75_vm4, %v1400_v36, 0.0 }
 0x37d   :  { %v484_v39 = vrot.slane %v482_v34, 5  ;;  %v628_v40 = vadd.f32 %v627_v35, %v626_v38 }
 0x37e   :  { %v495_v32 = vpop.permute.xlu0 %494 }
 0x37f   :  { %485 = vrot.lane.b32.xlu1 %v484_v39, %s1159_s0  ;;  %v497_v45 = vmul.f32 %v1348_v13, %v495_v32 }
 0x3f1   :  { %v486_v42 = vpop.permute.xlu1 %485 }
 0x3f2   :  { %v488_v43 = vsub.f32 %v1378_v5, %v486_v42 }
 0x3f4   :  { %v501_v44 = vrot.slane %v488_v43, %v500_v41  ;;  %v669_v43 = vsub.s32 4, %v1356_v23 }
 0x3f6   :  { %503 = vrot.lane.b32.xlu1 %v501_v44, %s1159_s0 }
 0x468   :  { %v504_v46 = vpop.permute.xlu1 %503 }
 0x469   :  { %v506_v47 = vadd.f32 %v504_v46, %v497_v45 }
 0x46b   :  { %v507_v48 = vmax.f32 %v506_v47, 0.0  ;;  %v676_v47 = vsub.s32 5, %v1356_v23 }
 0x46d   :  { %512 = vrot.lane.b32.xlu0 %v507_v48, %s1159_s0  ;;  %s757_s0 = sshll.u32 %s1167_s5, 4  ;;  %s758_s0 = int_to_ptr.vmem [resolvable:$true] %s757_s0 }
 0x46e   :  { %s1129_s22 = scalar_lea.vmem %s758_s0, 512  ;;  %p1134_p3 = scmp.lt.s32.totalorder %s758_s0, %s758_s0 }
 0x46f   :  { %p1130_p2 = scmp.ne.s32.totalorder %s758_s0, %s1129_s22  ;;  %p1135_p4 = scmp.lt.s32.totalorder %s1129_s22, %s1129_s22 }
 0x471   :  { %p1136_p5 = por %p1135_p4, %p1134_p3 }
 0x473   :  { %p1137_p6 = pnand %p1136_p5, %p1130_p2 }
 0x4df   :  { %v513_v1 = vpop.permute.xlu0 %512 }
 0x4e0   :  { %1003 = vmatmul.mubr.msk.f32.gmra.mrb[10].mxu0 %vm240_vm5, %v513_v1 }
 0x5b3   :  { %v1411_v49 = vpop.f32.mrb[10].mxu0 }
 0x5b4   :  { %v685_v50 = vsel %vm684_vm9, %v1411_v49, 0.0  ;;  %v617_v51 = vpop.f32.mrb[11].mxu0 }
 0x5b5   :  { %v686_v52 = vrot.slane %v685_v50, 4  ;;  %v629_v53 = vsel %vm75_vm4, %v617_v51, 0.0 }
 0x5b6   :  { %v630_v54 = vadd.f32 %v629_v53, %v628_v40 }
 0x5b7   :  { %v687_v13 = vadd.f32 %v686_v52, %v685_v50 }
 0x5b8   :  { %v631_v55 = vrot.slane %v630_v54, 4 }
 0x5b9   :  { %v688_v56 = vrot.slane %v687_v13, 2 }
 0x5ba   :  { %v632_v57 = vadd.f32 %v631_v55, %v630_v54 }
 0x5bb   :  { %v689_v58 = vadd.f32 %v688_v56, %v687_v13 }
 0x5bc   :  { %v633_v59 = vrot.slane %v632_v57, 2 }
 0x5bd   :  { %v690_v60 = vrot.slane %v689_v58, 1 }
 0x5be   :  { %v634_v61 = vadd.f32 %v633_v59, %v632_v57 }
 0x5bf   :  { %v691_v62 = vadd.f32 %v690_v60, %v689_v58 }
 0x5c0   :  { %v635_v63 = vrot.slane %v634_v61, 1 }
 0x5c1   :  { %v1416_v0 = vmul.f32 0.125, %v691_v62 }
 0x5c2   :  { %v636_v3 = vadd.f32 %v635_v63, %v634_v61 }
 0x5c3   :  { %v693_v4 = vsub.f32 %v1411_v49, %v1416_v0 }
 0x5c4   :  { %v637_v6 = vmul.f32 0.05, %v636_v3 }
 0x5c5   :  { %v694_v2 = vmul.f32 %v693_v4, %v693_v4  ;;  %v733_v4 = vsub.s32 7, %v1356_v23 }
 0x5c6   :  { %v638_v7 = vsub.f32 %v1400_v36, %v637_v6  ;;  %v639_v9 = vsub.f32 %v1395_v33, %v637_v6  ;;  %v640_v11 = vsub.f32 %v617_v51, %v637_v6 }
 0x5c7   :  { %v695_v12 = vsel %vm684_vm9, %v694_v2, 0.0 }
 0x5c8   :  { %v696_v14 = vrot.slane %v695_v12, 4  ;;  %v643_v16 = vmul.f32 %v1364_v37, %v640_v11  ;;  %v644_v17 = vmul.f32 %v638_v7, %v638_v7  ;;  %v645_v18 = vmul.f32 %v639_v9, %v639_v9 }
 0x5ca   :  { %v697_v19 = vadd.f32 %v696_v14, %v695_v12  ;;  %v646_v20 = vmul.f32 %v643_v16, %v643_v16  ;;  %v647_v21 = vsel %vm75_vm4, %v644_v17, 0.0  ;;  %v648_v22 = vsel %vm75_vm4, %v645_v18, 0.0 }
 0x5cb   :  { %v649_v24 = vadd.f32 %v648_v22, %v647_v21 }
 0x5cc   :  { %v698_v25 = vrot.slane %v697_v19, 2  ;;  %v650_v26 = vsel %vm75_vm4, %v646_v20, 0.0 }
 0x5cd   :  { %v651_v27 = vadd.f32 %v650_v26, %v649_v24 }
 0x5ce   :  { %v699_v28 = vadd.f32 %v698_v25, %v697_v19 }
 0x5cf   :  { %v652_v8 = vrot.slane %v651_v27, 4 }
 0x5d0   :  { %v700_v10 = vrot.slane %v699_v28, 1 }
 0x5d1   :  { %v653_v15 = vadd.f32 %v652_v8, %v651_v27 }
 0x5d2   :  { %v701_v29 = vadd.f32 %v700_v10, %v699_v28 }
 0x5d3   :  { %v654_v30 = vrot.slane %v653_v15, 2 }
 0x5d4   :  { %v702_v31 = vmul.f32 0.125, %v701_v29 }
 0x5d5   :  { %v655_v34 = vadd.f32 %v654_v30, %v653_v15 }
 0x5d6   :  { %v703_v35 = vadd.f32 1e-05, %v702_v31 }
 0x5d7   :  { %v656_v38 = vrot.slane %v655_v34, 1 }
 0x5d8   :  { %1081 = vrsqrt.f32 %v703_v35 }
 0x5d9   :  { %v657_v39 = vadd.f32 %v656_v38, %v655_v34 }
 0x5db   :  { %v658_v40 = vmul.f32 0.05, %v657_v39 }
 0x5dd   :  { %v659_v41 = vadd.f32 1e-05, %v658_v40 }
 0x5df   :  { %1083 = vrsqrt.f32 %v659_v41 }
 0x5e2   :  { %v1082_v42 = vpop.eup %1081 }
 0x5e3   :  { %706 = vrot.lane.b32.xlu1 %v1082_v42, %s1166_s12 }
 0x5e9   :  { %v1084_v44 = vpop.eup %1083 }
 0x5ea   :  { %v661_v32 = vmul.f32 %v1084_v44, %v1378_v5 }
 0x5ec   :  { %v662_v45 = vmul.f32 %v661_v32, %v637_v6  ;;  %v670_v46 = vrot.slane %v661_v32, %v669_v43 }
 0x5ee   :  { %v664_v48 = vrot.slane %v662_v45, 7  ;;  %v671_v1 = vmul.f32 %v670_v46, %v1400_v36  ;;  %v672_v50 = vmul.f32 %v1395_v33, %v670_v46  ;;  %v673_v52 = vmul.f32 %v670_v46, %v617_v51 }
 0x5ef   :  { %v724_v51 = vsub.s32 6, %v1356_v23 }
 0x5f0   :  { %v666_v53 = vsub.f32 %v1378_v5, %v664_v48 }
 0x5f2   :  { %v677_v54 = vrot.slane %v666_v53, %v676_v47 }
 0x5f4   :  { %v678_v13 = vadd.f32 %v677_v54, %v671_v1  ;;  %v679_v55 = vadd.f32 %v677_v54, %v672_v50  ;;  %v680_v56 = vadd.f32 %v677_v54, %v673_v52 }
 0x5f6   :  { %v681_v57 = vmax.f32 %v678_v13, 0.0  ;;  %v682_v58 = vmax.f32 %v679_v55, 0.0  ;;  %v683_v59 = vmax.f32 %v680_v56, 0.0 }
 0x5f8   :  { %v743_v60 = vmul.f32 %v1364_v37, %v683_v59  ;;  %748 = vst.msk [vmem:[#allocation7] sm:$0xff] %vm75_vm4, %v681_v57  ;;  %749 = vst.msk [vmem:[#allocation7 + $0x8] sm:$0xff] %vm75_vm4, %v682_v58 }
 0x5fa   :  { %750 = vst.msk [vmem:[#allocation7 + $0x10] sm:$0xff] %vm75_vm4, %v743_v60 }
 0x655   :  { %v707_v36 = vpop.permute.xlu1 %706 }
 0x656   :  { %v709_v33 = vmul.f32 %v707_v36, %v1378_v5 }
 0x658   :  { %v711_v61 = vrot.slane %v709_v33, 6  ;;  %v725_v62 = vrot.slane %v709_v33, %v724_v51 }
 0x65a   :  { %712 = vrot.lane.b32.xlu0 %v711_v61, %s1165_s2 }
 0x65e   :  { %727 = vrot.lane.b32.xlu0 %v725_v62, %s1165_s2 }
 0x6cc   :  { %v713_v63 = vpop.permute.xlu0 %712 }
 0x6cd   :  { %v715_v37 = vmul.f32 %v713_v63, %v1416_v0 }
 0x6cf   :  { %v717_v3 = vrot.slane %v715_v37, 1 }
 0x6d0   :  { %v728_v9 = vpop.permute.xlu0 %727 }
 0x6d1   :  { %718 = vrot.lane.b32.xlu1 %v717_v3, %s1166_s12  ;;  %v730_v11 = vmul.f32 %v1411_v49, %v728_v9 }
 0x743   :  { %v719_v6 = vpop.permute.xlu1 %718 }
 0x744   :  { %v721_v2 = vsub.f32 %v1378_v5, %v719_v6 }
 0x746   :  { %v734_v7 = vrot.slane %v721_v2, %v733_v4 }
 0x748   :  { %736 = vrot.lane.b32.xlu1 %v734_v7, %s1165_s2 }
 0x7ba   :  { %v737_v12 = vpop.permute.xlu1 %736 }
 0x7bb   :  { %v739_v14 = vadd.f32 %v737_v12, %v730_v11 }
 0x7bd   :  { %v740_v16 = vmax.f32 %v739_v14, 0.0 }
 0x7bf   :  { %745 = vrot.lane.b32.xlu0 %v740_v16, %s1166_s12 }
 0x831   :  { %v746_v0 = vpop.permute.xlu0 %745 }
 0x832   :  { %751 = vst.msk [vmem:[#allocation7 + $0x18] sm:$0xff] %vm75_vm4, %v746_v0 }
 0x833   :  { %1140 = shalt.err (!%p1137_p6)
}
 0x834   :  { %s1141_s24 = scalar_lea.hbm %s1468_s6, 512 }
 0x835   :  { %p1142_p7 = scmp.ne.s32.totalorder %s1468_s6, %s1141_s24  ;;  %p1145_p8 = scmp.lt.u32.totalorder %s1141_s24, %s1468_s6 }
 0x837   :  { %p1147_p9 = pnand %p1145_p8, %p1142_p7 }
 0x839   :  { %1150 = shalt.err (!%p1147_p9)
}
 0x83a   :  { %s1168_s29 = smov 128   ;;  %s1169_s30 = smov 8  }
 0x83b   :  { %763 = dma.vmem_to_hbm [thread:$0]  %s758_s0, 512, %s1468_s6, [#allocation4], %s1168_s29, %s1168_s29, %s1169_s30  }
 0x83c   :  { %1155 = dma.done.wait [#allocation4], 512  }
 0x83d   :  { %1156 = vsyncadd [#allocation4], 4294966784 }
 0x83e   :  { %767 = vsyncpa [#allocation3], 1 }
 0x83f   :  { %768 = vsyncpa [#allocation6], 1 }
 0x840   :  { %769 = vsyncpa [#allocation4], 1 }

</bundles_post_ra>
